<compile_context>
chip_gen: v7x
topology: tpu7x:2x2x1
jax: 0.10.0
libtpu: 0.0.40
codegen_flags: <defaults>
</compile_context>

<pallas_src>
import functools

import jax
import jax.numpy as jnp
from jax.experimental import pallas as pl
from jax.experimental.pallas import tpu as pltpu


def _drr_kernel(user_ref, item_ref, ctx_ref,
                wfav_ref, bfav_ref, wattn_ref, battn_ref,
                out_ref, *, S, E):
    user = user_ref[...]                        # (TM, E)    f32
    item2d = item_ref[...]                      # (TM, S*E)  f32, lane-dense
    ctx = ctx_ref[...]                          # (TM, C)    f32 or bf16

    # ce = ReLU(context @ W_fav^T + b_fav); W_fav is passed pre-transposed (C, E).
    ce = jnp.dot(ctx, wfav_ref[...], preferred_element_type=jnp.float32)
    ce = jnp.maximum(ce + bfav_ref[...], 0.0)                  # (TM, E) f32

    # Attention logits eij[b, s] = tanh(sum_e item[b, s, e] * w_attn[e] + b_attn[s]).
    # S is tiny (8): short unrolled static-slice loop over the flattened item.
    # The per-chunk lane reduces run on the XLU and co-issue with the MXU matmul
    # (deliberately NOT mapped to the MXU: contraction widths E=32 / N=1 would
    # leave it <1% utilized).
    w_attn = wattn_ref[...]                                    # (1, E)
    eij_cols = []
    for s in range(S):
        chunk = item2d[:, s * E:(s + 1) * E]                   # (TM, E)
        eij_cols.append(jnp.sum(chunk * w_attn, axis=-1, keepdims=True))
    eij = jnp.concatenate(eij_cols, axis=1)                    # (TM, S)
    eij = jnp.tanh(eij + battn_ref[...])

    # No max-subtraction needed: tanh bounds eij to [-1, 1], so exp cannot
    # overflow (same invariant as the PyTorch module). Revisit if the
    # activation ever changes.
    a = jnp.exp(eij)                                           # (TM, S)
    denom = jnp.sum(a, axis=1, keepdims=True) + 1e-10
    a = a * pl.reciprocal(denom, approx=True)                  # EUP slot

    # drr_ave[b, :] = sum_s a[b, s] * item[b, s, :]
    drr = a[:, 0:1] * item2d[:, 0:E]
    for s in range(1, S):
        drr = drr + a[:, s:s + 1] * item2d[:, s * E:(s + 1) * E]
    drr = drr * ce                                             # (TM, E)

    # Single full-block store (avoids three masked lane-offset partial stores).
    out_ref[...] = jnp.concatenate([user, user * drr, drr], axis=1)


def prepare_params(w_fav, b_fav, w_attn, b_attn):
    """One-time parameter re-layout, hoisted out of the per-call forward."""
    E, C = w_fav.shape
    S = b_attn.shape[0]
    return {
        "w_fav_t": jnp.asarray(w_fav).T,               # (C, E): kernel does ctx @ W
        "b_fav": jnp.asarray(b_fav).reshape(1, E),
        "w_attn": jnp.asarray(w_attn).reshape(1, E),   # (E, 1) -> (1, E)
        "b_attn": jnp.asarray(b_attn).reshape(1, S),
    }


@functools.partial(jax.jit, static_argnames=("tm", "use_bf16"))
def drr_ave_context_forward(user, item, context, params, *, tm=1024, use_bf16=False):
    """Forward pass. `params` from prepare_params(). `tm` = batch tile size."""
    B, E = user.shape
    S = item.shape[1]
    C = context.shape[1]

    # Flatten item to (B, S*E): 256 lanes instead of a 32/128-padded last dim.
    item2d = item.reshape(B, S * E)

    w_fav_t = params["w_fav_t"]
    if use_bf16:
        # Halves the dominant HBM traffic (context is the biggest byte mover);
        # matmul still accumulates in f32, elementwise chain stays f32.
        context = context.astype(jnp.bfloat16)
        w_fav_t = w_fav_t.astype(jnp.bfloat16)

    # Batch tile: whole array for small B, otherwise a multiple-of-8 tile.
    # tm=1024 keeps the double-buffered working set well under the scoped VMEM
    # default on v5e (16 MiB) and v7x (32 MiB of 64 MiB physical).
    if B <= tm:
        TM = B
    else:
        assert tm % 8 == 0, "batch tile must be a multiple of 8 (f32 sublane)"
        TM = tm
    grid = (pl.cdiv(B, TM),)

    kernel = functools.partial(_drr_kernel, S=S, E=E)

    return pl.pallas_call(
        kernel,
        out_shape=jax.ShapeDtypeStruct((B, 3 * E), jnp.float32),
        grid=grid,
        in_specs=[
            pl.BlockSpec((TM, E), lambda i: (i, 0)),        # user
            pl.BlockSpec((TM, S * E), lambda i: (i, 0)),    # item (flattened)
            pl.BlockSpec((TM, C), lambda i: (i, 0)),        # context
            pl.BlockSpec((C, E), lambda i: (0, 0)),         # W_fav^T (resident)
            pl.BlockSpec((1, E), lambda i: (0, 0)),         # b_fav   (resident)
            pl.BlockSpec((1, E), lambda i: (0, 0)),         # w_attn  (resident)
            pl.BlockSpec((1, S), lambda i: (0, 0)),         # b_attn  (resident)
        ],
        out_specs=pl.BlockSpec((TM, 3 * E), lambda i: (i, 0)),
        compiler_params=pltpu.CompilerParams(
            dimension_semantics=("parallel",)),             # v7x megacore sharding
    )(user, item2d, context, w_fav_t,
      params["b_fav"], params["w_attn"], params["b_attn"])


def reference_forward(user, item, context, w_fav, b_fav, w_attn, b_attn):
    ce = jax.nn.relu(context @ w_fav.T + b_fav)
    eij = (item.reshape(-1, item.shape[-1]) @ w_attn).reshape(item.shape[0], -1)
    eij = jnp.tanh(eij + b_attn)
    a = jnp.exp(eij)
    a = a / (jnp.sum(a, axis=1, keepdims=True) + 1e-10)
    drr = jnp.sum(item * a[:, :, None], axis=1) * ce
    return jnp.concatenate([user, user * drr, drr], axis=1)


if __name__ == "__main__":
    E, S, C = 32, 8, 512  # embedding_dim, state_size, context width (fixed 512)

    key = jax.random.PRNGKey(0)
    k_user, k_item, k_ctx, k_wfav, k_wattn = jax.random.split(key, 5)

    # Parameter init mimicking the module: fav.weight ~ U[0,1), fav.bias = 0,
    # attention weight kaiming_uniform on (E, 1) (fan_in=1 -> bound=sqrt(6)), bias 0.
    w_fav = jax.random.uniform(k_wfav, (E, C), jnp.float32, 0.0, 1.0)
    b_fav = jnp.zeros((E,), jnp.float32)
    bound = float(jnp.sqrt(6.0))
    w_attn = jax.random.uniform(k_wattn, (E, 1), jnp.float32, -bound, bound)
    b_attn = jnp.zeros((S,), jnp.float32)
    params = prepare_params(w_fav, b_fav, w_attn, b_attn)

    # 1) Small-batch check (single whole block), f32 path.
    B = 2
    user = jax.random.normal(k_user, (B, E), jnp.float32)
    item = jax.random.normal(k_item, (B, S, E), jnp.float32)
    context = jax.random.normal(k_ctx, (B, C), jnp.float32)

    out = jax.block_until_ready(drr_ave_context_forward(user, item, context, params))
    ref = reference_forward(user, item, context, w_fav, b_fav, w_attn, b_attn)
    assert out.shape == (B, 3 * E)
    assert jnp.allclose(out, ref, atol=1e-3, rtol=1e-2), \
        float(jnp.max(jnp.abs(out - ref)))

    # 2) Gridded check: multiple batch tiles (exercises the pipelined grid).
    B2 = 64
    ku, ki, kc = jax.random.split(jax.random.PRNGKey(1), 3)
    user2 = jax.random.normal(ku, (B2, E), jnp.float32)
    item2 = jax.random.normal(ki, (B2, S, E), jnp.float32)
    context2 = jax.random.normal(kc, (B2, C), jnp.float32)

    out2 = jax.block_until_ready(
        drr_ave_context_forward(user2, item2, context2, params, tm=16))
    ref2 = reference_forward(user2, item2, context2, w_fav, b_fav, w_attn, b_attn)
    assert jnp.allclose(out2, ref2, atol=1e-3, rtol=1e-2), \
        float(jnp.max(jnp.abs(out2 - ref2)))

    # 3) bf16 context/weight path (v6e/v7x DMA saver); looser tolerance vs f32 ref.
    out3 = jax.block_until_ready(
        drr_ave_context_forward(user2, item2, context2, params, tm=16, use_bf16=True))
    assert jnp.allclose(out3, ref2, atol=5e-1, rtol=5e-2), \
        float(jnp.max(jnp.abs(out3 - ref2)))

    print("KERNEL_OK")
</pallas_src>

<mosaic_0001>
module attributes {stable_mosaic.version = 11 : i64} {
  func.func @_drr_kernel(%arg0: i32, %arg1: memref<2x32xf32, #tpu.memory_space<vmem>>, %arg2: memref<2x256xf32, #tpu.memory_space<vmem>>, %arg3: memref<2x512xf32, #tpu.memory_space<vmem>>, %arg4: memref<512x32xf32, #tpu.memory_space<vmem>>, %arg5: memref<1x32xf32, #tpu.memory_space<vmem>>, %arg6: memref<1x32xf32, #tpu.memory_space<vmem>>, %arg7: memref<1x8xf32, #tpu.memory_space<vmem>>, %arg8: memref<2x96xf32, #tpu.memory_space<vmem>>) attributes {dimension_semantics = [#tpu.dimension_semantics<parallel>], iteration_bounds = array<i64: 1>, scalar_prefetch = 0 : i64, scratch_operands = 0 : i64, tpu.core_type = #tpu.core_type<tc>, window_params = [{transform_indices = @transform_0, window_bounds = array<i64: 2, 32>}, {transform_indices = @transform_1, window_bounds = array<i64: 2, 256>}, {transform_indices = @transform_2, window_bounds = array<i64: 2, 512>}, {pipeline_mode = #tpu.pipeline_mode<synchronous>, transform_indices = @transform_3, window_bounds = array<i64: 512, 32>}, {pipeline_mode = #tpu.pipeline_mode<synchronous>, transform_indices = @transform_4, window_bounds = array<i64: 1, 32>}, {pipeline_mode = #tpu.pipeline_mode<synchronous>, transform_indices = @transform_5, window_bounds = array<i64: 1, 32>}, {pipeline_mode = #tpu.pipeline_mode<synchronous>, transform_indices = @transform_6, window_bounds = array<i64: 1, 8>}, {transform_indices = @transform_7, window_bounds = array<i64: 2, 96>}]} {
    %c0 = arith.constant 0 : index
    %c0_0 = arith.constant 0 : index
    %0 = vector.load %arg1[%c0, %c0_0] : memref<2x32xf32, #tpu.memory_space<vmem>>, vector<2x32xf32>
    %c0_1 = arith.constant 0 : index
    %c0_2 = arith.constant 0 : index
    %1 = vector.load %arg2[%c0_1, %c0_2] : memref<2x256xf32, #tpu.memory_space<vmem>>, vector<2x256xf32>
    %c0_3 = arith.constant 0 : index
    %c0_4 = arith.constant 0 : index
    %2 = vector.load %arg3[%c0_3, %c0_4] : memref<2x512xf32, #tpu.memory_space<vmem>>, vector<2x512xf32>
    %c0_5 = arith.constant 0 : index
    %c0_6 = arith.constant 0 : index
    %3 = vector.load %arg4[%c0_5, %c0_6] : memref<512x32xf32, #tpu.memory_space<vmem>>, vector<512x32xf32>
    %cst = arith.constant dense<0.000000e+00> : vector<2x32xf32>
    %4 = tpu.matmul %2, %3, %cst {dimension_numbers = #tpu.dot_dimension_numbers<[1], [0], [0], [1], [0, 0, 1, 1], [], []>} : vector<2x512xf32>, vector<512x32xf32>, vector<2x32xf32> -> vector<2x32xf32>
    %c0_7 = arith.constant 0 : index
    %c0_8 = arith.constant 0 : index
    %5 = vector.load %arg5[%c0_7, %c0_8] : memref<1x32xf32, #tpu.memory_space<vmem>>, vector<1x32xf32>
    %6 = vector.broadcast %5 : vector<1x32xf32> to vector<2x32xf32>
    %7 = arith.addf %4, %6 : vector<2x32xf32>
    %cst_9 = arith.constant 0.000000e+00 : f32
    %8 = vector.broadcast %cst_9 : f32 to vector<2x32xf32>
    %9 = arith.maximumf %7, %8 : vector<2x32xf32>
    %c0_10 = arith.constant 0 : index
    %c0_11 = arith.constant 0 : index
    %10 = vector.load %arg6[%c0_10, %c0_11] : memref<1x32xf32, #tpu.memory_space<vmem>>, vector<1x32xf32>
    %11 = vector.extract_strided_slice %1 {offsets = [0, 0], sizes = [2, 32], strides = [1, 1]} : vector<2x256xf32> to vector<2x32xf32>
    %12 = vector.broadcast %10 : vector<1x32xf32> to vector<2x32xf32>
    %13 = arith.mulf %11, %12 : vector<2x32xf32>
    %cst_12 = arith.constant dense<0.000000e+00> : vector<2xf32>
    %14 = vector.multi_reduction <add>, %13, %cst_12 [1] : vector<2x32xf32> to vector<2xf32>
    %15 = vector.shape_cast %14 : vector<2xf32> to vector<2x1xf32>
    %16 = vector.extract_strided_slice %1 {offsets = [0, 32], sizes = [2, 32], strides = [1, 1]} : vector<2x256xf32> to vector<2x32xf32>
    %17 = vector.broadcast %10 : vector<1x32xf32> to vector<2x32xf32>
    %18 = arith.mulf %16, %17 : vector<2x32xf32>
    %cst_13 = arith.constant dense<0.000000e+00> : vector<2xf32>
    %19 = vector.multi_reduction <add>, %18, %cst_13 [1] : vector<2x32xf32> to vector<2xf32>
    %20 = vector.shape_cast %19 : vector<2xf32> to vector<2x1xf32>
    %21 = vector.extract_strided_slice %1 {offsets = [0, 64], sizes = [2, 32], strides = [1, 1]} : vector<2x256xf32> to vector<2x32xf32>
    %22 = vector.broadcast %10 : vector<1x32xf32> to vector<2x32xf32>
    %23 = arith.mulf %21, %22 : vector<2x32xf32>
    %cst_14 = arith.constant dense<0.000000e+00> : vector<2xf32>
    %24 = vector.multi_reduction <add>, %23, %cst_14 [1] : vector<2x32xf32> to vector<2xf32>
    %25 = vector.shape_cast %24 : vector<2xf32> to vector<2x1xf32>
    %26 = vector.extract_strided_slice %1 {offsets = [0, 96], sizes = [2, 32], strides = [1, 1]} : vector<2x256xf32> to vector<2x32xf32>
    %27 = vector.broadcast %10 : vector<1x32xf32> to vector<2x32xf32>
    %28 = arith.mulf %26, %27 : vector<2x32xf32>
    %cst_15 = arith.constant dense<0.000000e+00> : vector<2xf32>
    %29 = vector.multi_reduction <add>, %28, %cst_15 [1] : vector<2x32xf32> to vector<2xf32>
    %30 = vector.shape_cast %29 : vector<2xf32> to vector<2x1xf32>
    %31 = vector.extract_strided_slice %1 {offsets = [0, 128], sizes = [2, 32], strides = [1, 1]} : vector<2x256xf32> to vector<2x32xf32>
    %32 = vector.broadcast %10 : vector<1x32xf32> to vector<2x32xf32>
    %33 = arith.mulf %31, %32 : vector<2x32xf32>
    %cst_16 = arith.constant dense<0.000000e+00> : vector<2xf32>
    %34 = vector.multi_reduction <add>, %33, %cst_16 [1] : vector<2x32xf32> to vector<2xf32>
    %35 = vector.shape_cast %34 : vector<2xf32> to vector<2x1xf32>
    %36 = vector.extract_strided_slice %1 {offsets = [0, 160], sizes = [2, 32], strides = [1, 1]} : vector<2x256xf32> to vector<2x32xf32>
    %37 = vector.broadcast %10 : vector<1x32xf32> to vector<2x32xf32>
    %38 = arith.mulf %36, %37 : vector<2x32xf32>
    %cst_17 = arith.constant dense<0.000000e+00> : vector<2xf32>
    %39 = vector.multi_reduction <add>, %38, %cst_17 [1] : vector<2x32xf32> to vector<2xf32>
    %40 = vector.shape_cast %39 : vector<2xf32> to vector<2x1xf32>
    %41 = vector.extract_strided_slice %1 {offsets = [0, 192], sizes = [2, 32], strides = [1, 1]} : vector<2x256xf32> to vector<2x32xf32>
    %42 = vector.broadcast %10 : vector<1x32xf32> to vector<2x32xf32>
    %43 = arith.mulf %41, %42 : vector<2x32xf32>
    %cst_18 = arith.constant dense<0.000000e+00> : vector<2xf32>
    %44 = vector.multi_reduction <add>, %43, %cst_18 [1] : vector<2x32xf32> to vector<2xf32>
    %45 = vector.shape_cast %44 : vector<2xf32> to vector<2x1xf32>
    %46 = vector.extract_strided_slice %1 {offsets = [0, 224], sizes = [2, 32], strides = [1, 1]} : vector<2x256xf32> to vector<2x32xf32>
    %47 = vector.broadcast %10 : vector<1x32xf32> to vector<2x32xf32>
    %48 = arith.mulf %46, %47 : vector<2x32xf32>
    %cst_19 = arith.constant dense<0.000000e+00> : vector<2xf32>
    %49 = vector.multi_reduction <add>, %48, %cst_19 [1] : vector<2x32xf32> to vector<2xf32>
    %50 = vector.shape_cast %49 : vector<2xf32> to vector<2x1xf32>
    %51 = tpu.concatenate %15, %20, %25, %30, %35, %40, %45, %50 in 1 : vector<2x1xf32>, vector<2x1xf32>, vector<2x1xf32>, vector<2x1xf32>, vector<2x1xf32>, vector<2x1xf32>, vector<2x1xf32>, vector<2x1xf32> -> vector<2x8xf32>
    %c0_20 = arith.constant 0 : index
    %c0_21 = arith.constant 0 : index
    %52 = vector.load %arg7[%c0_20, %c0_21] : memref<1x8xf32, #tpu.memory_space<vmem>>, vector<1x8xf32>
    %53 = vector.broadcast %52 : vector<1x8xf32> to vector<2x8xf32>
    %54 = arith.addf %51, %53 : vector<2x8xf32>
    %55 = math.tanh %54 : vector<2x8xf32>
    %56 = math.exp %55 : vector<2x8xf32>
    %cst_22 = arith.constant dense<0.000000e+00> : vector<2xf32>
    %57 = vector.multi_reduction <add>, %56, %cst_22 [1] : vector<2x8xf32> to vector<2xf32>
    %58 = vector.shape_cast %57 : vector<2xf32> to vector<2x1xf32>
    %cst_23 = arith.constant 1.000000e-10 : f32
    %59 = vector.broadcast %cst_23 : f32 to vector<2x1xf32>
    %60 = arith.addf %58, %59 : vector<2x1xf32>
    %61 = tpu.reciprocal %60 {approx = true} : vector<2x1xf32> -> vector<2x1xf32>
    %62 = vector.broadcast %61 : vector<2x1xf32> to vector<2x8xf32>
    %63 = arith.mulf %56, %62 : vector<2x8xf32>
    %64 = vector.extract_strided_slice %63 {offsets = [0, 0], sizes = [2, 1], strides = [1, 1]} : vector<2x8xf32> to vector<2x1xf32>
    %65 = vector.extract_strided_slice %1 {offsets = [0, 0], sizes = [2, 32], strides = [1, 1]} : vector<2x256xf32> to vector<2x32xf32>
    %66 = vector.broadcast %64 : vector<2x1xf32> to vector<2x32xf32>
    %67 = arith.mulf %66, %65 : vector<2x32xf32>
    %68 = vector.extract_strided_slice %63 {offsets = [0, 1], sizes = [2, 1], strides = [1, 1]} : vector<2x8xf32> to vector<2x1xf32>
    %69 = vector.extract_strided_slice %1 {offsets = [0, 32], sizes = [2, 32], strides = [1, 1]} : vector<2x256xf32> to vector<2x32xf32>
    %70 = vector.broadcast %68 : vector<2x1xf32> to vector<2x32xf32>
    %71 = arith.mulf %70, %69 : vector<2x32xf32>
    %72 = arith.addf %67, %71 : vector<2x32xf32>
    %73 = vector.extract_strided_slice %63 {offsets = [0, 2], sizes = [2, 1], strides = [1, 1]} : vector<2x8xf32> to vector<2x1xf32>
    %74 = vector.extract_strided_slice %1 {offsets = [0, 64], sizes = [2, 32], strides = [1, 1]} : vector<2x256xf32> to vector<2x32xf32>
    %75 = vector.broadcast %73 : vector<2x1xf32> to vector<2x32xf32>
    %76 = arith.mulf %75, %74 : vector<2x32xf32>
    %77 = arith.addf %72, %76 : vector<2x32xf32>
    %78 = vector.extract_strided_slice %63 {offsets = [0, 3], sizes = [2, 1], strides = [1, 1]} : vector<2x8xf32> to vector<2x1xf32>
    %79 = vector.extract_strided_slice %1 {offsets = [0, 96], sizes = [2, 32], strides = [1, 1]} : vector<2x256xf32> to vector<2x32xf32>
    %80 = vector.broadcast %78 : vector<2x1xf32> to vector<2x32xf32>
    %81 = arith.mulf %80, %79 : vector<2x32xf32>
    %82 = arith.addf %77, %81 : vector<2x32xf32>
    %83 = vector.extract_strided_slice %63 {offsets = [0, 4], sizes = [2, 1], strides = [1, 1]} : vector<2x8xf32> to vector<2x1xf32>
    %84 = vector.extract_strided_slice %1 {offsets = [0, 128], sizes = [2, 32], strides = [1, 1]} : vector<2x256xf32> to vector<2x32xf32>
    %85 = vector.broadcast %83 : vector<2x1xf32> to vector<2x32xf32>
    %86 = arith.mulf %85, %84 : vector<2x32xf32>
    %87 = arith.addf %82, %86 : vector<2x32xf32>
    %88 = vector.extract_strided_slice %63 {offsets = [0, 5], sizes = [2, 1], strides = [1, 1]} : vector<2x8xf32> to vector<2x1xf32>
    %89 = vector.extract_strided_slice %1 {offsets = [0, 160], sizes = [2, 32], strides = [1, 1]} : vector<2x256xf32> to vector<2x32xf32>
    %90 = vector.broadcast %88 : vector<2x1xf32> to vector<2x32xf32>
    %91 = arith.mulf %90, %89 : vector<2x32xf32>
    %92 = arith.addf %87, %91 : vector<2x32xf32>
    %93 = vector.extract_strided_slice %63 {offsets = [0, 6], sizes = [2, 1], strides = [1, 1]} : vector<2x8xf32> to vector<2x1xf32>
    %94 = vector.extract_strided_slice %1 {offsets = [0, 192], sizes = [2, 32], strides = [1, 1]} : vector<2x256xf32> to vector<2x32xf32>
    %95 = vector.broadcast %93 : vector<2x1xf32> to vector<2x32xf32>
    %96 = arith.mulf %95, %94 : vector<2x32xf32>
    %97 = arith.addf %92, %96 : vector<2x32xf32>
    %98 = vector.extract_strided_slice %63 {offsets = [0, 7], sizes = [2, 1], strides = [1, 1]} : vector<2x8xf32> to vector<2x1xf32>
    %99 = vector.extract_strided_slice %1 {offsets = [0, 224], sizes = [2, 32], strides = [1, 1]} : vector<2x256xf32> to vector<2x32xf32>
    %100 = vector.broadcast %98 : vector<2x1xf32> to vector<2x32xf32>
    %101 = arith.mulf %100, %99 : vector<2x32xf32>
    %102 = arith.addf %97, %101 : vector<2x32xf32>
    %103 = arith.mulf %102, %9 : vector<2x32xf32>
    %104 = arith.mulf %0, %103 : vector<2x32xf32>
    %105 = tpu.concatenate %0, %104, %103 in 1 : vector<2x32xf32>, vector<2x32xf32>, vector<2x32xf32> -> vector<2x96xf32>
    %c0_24 = arith.constant 0 : index
    %c0_25 = arith.constant 0 : index
    %106 = vector.load %arg8[%c0_24, %c0_25] : memref<2x96xf32, #tpu.memory_space<vmem>>, vector<2x96xf32>
    tpu.vector_store %arg8[%c0_24, %c0_25], %105 {strides = array<i32>} : memref<2x96xf32, #tpu.memory_space<vmem>>, vector<2x96xf32>,
    return
  }
  func.func @transform_0(%arg0: i32) -> (i32, i32) {
    %c0_i32 = arith.constant 0 : i32
    %c0_i32_0 = arith.constant 0 : i32
    return %arg0, %c0_i32 : i32, i32
  }
  func.func @transform_1(%arg0: i32) -> (i32, i32) {
    %c0_i32 = arith.constant 0 : i32
    %c0_i32_0 = arith.constant 0 : i32
    return %arg0, %c0_i32 : i32, i32
  }
  func.func @transform_2(%arg0: i32) -> (i32, i32) {
    %c0_i32 = arith.constant 0 : i32
    %c0_i32_0 = arith.constant 0 : i32
    return %arg0, %c0_i32 : i32, i32
  }
  func.func @transform_3(%arg0: i32) -> (i32, i32) {
    %c0_i32 = arith.constant 0 : i32
    %c0_i32_0 = arith.constant 0 : i32
    %c0_i32_1 = arith.constant 0 : i32
    return %c0_i32, %c0_i32_0 : i32, i32
  }
  func.func @transform_4(%arg0: i32) -> (i32, i32) {
    %c0_i32 = arith.constant 0 : i32
    %c0_i32_0 = arith.constant 0 : i32
    %c0_i32_1 = arith.constant 0 : i32
    return %c0_i32, %c0_i32_0 : i32, i32
  }
  func.func @transform_5(%arg0: i32) -> (i32, i32) {
    %c0_i32 = arith.constant 0 : i32
    %c0_i32_0 = arith.constant 0 : i32
    %c0_i32_1 = arith.constant 0 : i32
    return %c0_i32, %c0_i32_0 : i32, i32
  }
  func.func @transform_6(%arg0: i32) -> (i32, i32) {
    %c0_i32 = arith.constant 0 : i32
    %c0_i32_0 = arith.constant 0 : i32
    %c0_i32_1 = arith.constant 0 : i32
    return %c0_i32, %c0_i32_0 : i32, i32
  }
  func.func @transform_7(%arg0: i32) -> (i32, i32) {
    %c0_i32 = arith.constant 0 : i32
    %c0_i32_0 = arith.constant 0 : i32
    return %arg0, %c0_i32 : i32, i32
  }
}

</mosaic_0001>

<bundles_post_ra>
// kernel: drr_ave_context_forward.1
= control target key start
LH: loop header
LB: loop body
LE: loop exit
PB: predicated region body
PF: predicated region fallthrough
CT: control target
= control target key end

     0   :  { %v106_v0 = vlaneseq  ;;  %v695_v1 = vmov 1983009808   ;;  %s1016_s0 = inlined_call_operand.vmem [shape: f32[2,32], index: 0, kind: input, shape index: {}]   ;;  %s1017_s1 = inlined_call_operand.vmem [shape: f32[2,256], index: 1, kind: input, shape index: {}]   ;;  %s1018_s2 = inlined_call_operand.vmem [shape: f32[2,512], index: 2, kind: input, shape index: {}]   ;;  %s1019_s3 = inlined_call_operand.vmem [shape: f32[512,32], index: 3, kind: input, shape index: {}]   ;;  %s1020_s4 = inlined_call_operand.vmem [shape: f32[1,32], index: 4, kind: input, shape index: {}]   ;;  %s1021_s5 = inlined_call_operand.vmem [shape: f32[1,32], index: 5, kind: input, shape index: {}]   ;;  %s1022_s6 = inlined_call_operand.vmem [shape: f32[1,8], index: 6, kind: input, shape index: {}]   ;;  %s1023_s7 = inlined_call_operand.hbm [shape: f32[2,96], index: 7, kind: output, shape index: {}]  }
   0x1   :  { %v104_v2 = vunpack.c.l.s4 %v695_v1 }
   0x2   :  { %12 = vsyncpa [#allocation3], 0  ;;  %v107_v3 = vshrl.u32 %v106_v0, 7  ;;  %v506_v5 = vld [vmem:[%s1021_s5] ss:$0 sm:$0xff]  ;;  %s696_s26 = smov 32  }
   0x3   :  { %v105_v4 = vunpack.c.0.s8 %v104_v2  ;;  %s697_s27 = smov 96   ;;  %s698_s28 = smov 64   ;;  %v760_v8 = vld [vmem:[%s1017_s1] sm:$0xf]  ;;  %vm272_vm0 = vcmask 254976   ;;  %v47_v42 = vld [vmem:[%s1019_s3 + $0x88] sm:$0xff] }
   0x4   :  { %v338_v9 = vrot.slane %v760_v8, 2  ;;  %v271_v23 = vmul.f32 %v506_v5, %v760_v8  ;;  %v46_v41 = vld [vmem:[%s1019_s3 + $0x80] sm:$0xff]  ;;  %v31_v45 = vld [vmem:[%s1019_s3 + $0x8] sm:$0xff]  ;;  %v48_v52 = vld [vmem:[%s1019_s3 + $0x90] sm:$0xff]  ;;  %vm368_vm1 = vcmask 7168   ;;  %vm370_vm2 = vcmask 15360  }
   0x5   :  { %v751_v6 = vsub.s32 %v105_v4, %v107_v3  ;;  %v30_v43 = vld [vmem:[%s1019_s3] sm:$0xff]  ;;  %v578_v44 = vpack.c.bf16 %v47_v42, %v46_v41  ;;  %v79_v47 = vld [vmem:[%s1019_s3 + $0x188] sm:$0xff]  ;;  %v49_v54 = vld [vmem:[%s1019_s3 + $0x98] sm:$0xff]  ;;  %vm372_vm3 = vcmask 23552   ;;  %vm374_vm4 = vcmask 31744   ;;  %s707_s30 = smov [#allocation2]  }
   0x6   :  { %v340_v10 = vmul.f32 %v506_v5, %v338_v9  ;;  %v273_v24 = vsel %vm272_vm0, %v271_v23, 0.0  ;;  %v78_v46 = vld [vmem:[%s1019_s3 + $0x180] sm:$0xff]  ;;  %v580_v48 = vpack.c.bf16 %v31_v45, %v30_v43  ;;  %v63_v51 = vld [vmem:[%s1019_s3 + $0x108] sm:$0xff]  ;;  %v32_v55 = vld [vmem:[%s1019_s3 + $0x10] sm:$0xff]  ;;  %v582_v57 = vpack.c.bf16 %v49_v54, %v48_v52  ;;  %s497_s1 = sshll.u32 %s707_s30, 4  ;;  %s498_s1 = int_to_ptr.vmem [resolvable:$true] %s497_s1 }
   0x7   :  { %v282_v7 = vrot.slane %v506_v5, %v751_v6  ;;  %v610_v49 = vpack.c.bf16 %v79_v47, %v78_v46  ;;  %v62_v50 = vld [vmem:[%s1019_s3 + $0x100] sm:$0xff]  ;;  %579 = vmatprep.subr.bf16.mxu0 %v578_v44  ;;  %v33_v56 = vld [vmem:[%s1019_s3 + $0x18] sm:$0xff]  ;;  %v80_v59 = vld [vmem:[%s1019_s3 + $0x190] sm:$0xff]  ;;  %vm376_vm5 = vcmask 39936   ;;  %vm378_vm6 = vcmask 48128   ;;  %s671_s5 = scalar_lea.vmem %s498_s1, 32  ;;  %p676_p1 = scmp.lt.s32.totalorder %s498_s1, %s498_s1 }
   0x8   :  { %v341_v11 = vsel %vm272_vm0, %v340_v10, 0.0  ;;  %v612_v53 = vpack.c.bf16 %v63_v51, %v62_v50  ;;  %581 = vmatpush3.bf16.msra.mxu0 %v580_v48  ;;  %v584_v58 = vpack.c.bf16 %v33_v56, %v32_v55  ;;  %v81_v60 = vld [vmem:[%s1019_s3 + $0x198] sm:$0xff]  ;;  %v64_v61 = vld [vmem:[%s1019_s3 + $0x110] sm:$0xff]  ;;  %v50_v0 = vld [vmem:[%s1019_s3 + $0xa0] sm:$0xff]  ;;  %vm380_vm7 = vcmask 56320   ;;  %p672_p0 = scmp.ne.s32.totalorder %s498_s1, %s671_s5  ;;  %p677_p2 = scmp.lt.s32.totalorder %s671_s5, %s671_s5 }
   0x9   :  { %283 = vrot.lane.b32.xlu0 %v282_v7, %s696_s26  ;;  %319 = vrot.lane.b32.xlu1 %v282_v7, %s697_s27  ;;  %v614_v62 = vpack.c.bf16 %v81_v60, %v80_v59  ;;  %v65_v63 = vld [vmem:[%s1019_s3 + $0x118] sm:$0xff]  ;;  %v51_v1 = vld [vmem:[%s1019_s3 + $0xa8] sm:$0xff]  ;;  %vm393_vm8 = vcmask 58368   ;;  %vm485_vm9 = vcmask 261120   ;;  %vm487_vm10 = vcmask 523264  }
   0xa   :  { %611 = vmatprep.subr.bf16.mxu1 %v610_v49  ;;  %583 = vmatprep.subr.bf16.mxu0 %v582_v57  ;;  %v616_v2 = vpack.c.bf16 %v65_v63, %v64_v61  ;;  %v586_v3 = vpack.c.bf16 %v51_v1, %v50_v0  ;;  %v34_v4 = vld [vmem:[%s1019_s3 + $0x20] sm:$0xff]  ;;  %v83_v9 = vld [vmem:[%s1019_s3 + $0x1a8] sm:$0xff]  ;;  %v68_v23 = vld [vmem:[%s1019_s3 + $0x130] sm:$0xff]  ;;  %vm489_vm11 = vcmask 779264   ;;  %p678_p3 = por %p677_p2, %p676_p1 }
   0xb   :  { %613 = vmatpush3.bf16.msra.mxu1 %v612_v53  ;;  %v66_v10 = vld [vmem:[%s1019_s3 + $0x120] sm:$0xff]  ;;  %v40_v42 = vld [vmem:[%s1019_s3 + $0x50] sm:$0xff]  ;;  %v41_v45 = vld [vmem:[%s1019_s3 + $0x58] sm:$0xff] }
   0xc   :  { %615 = vmatprep.subr.bf16.mxu1 %v614_v62  ;;  %585 = vmatpush3.bf16.msra.mxu0 %v584_v58  ;;  %v72_v46 = vld [vmem:[%s1019_s3 + $0x150] sm:$0xff]  ;;  %v73_v47 = vld [vmem:[%s1019_s3 + $0x158] sm:$0xff]  ;;  %v58_v49 = vld [vmem:[%s1019_s3 + $0xe0] sm:$0xff]  ;;  %v600_v53 = vpack.c.bf16 %v41_v45, %v40_v42  ;;  %p679_p4 = pnand %p678_p3, %p672_p0 }
   0xd   :  { %301 = vrot.lane.b32.xlu0 %v282_v7, %s698_s28  ;;  %v82_v7 = vld [vmem:[%s1019_s3 + $0x1a0] sm:$0xff]  ;;  %587 = vmatprep.subr.bf16.mxu0 %v586_v3  ;;  %v59_v50 = vld [vmem:[%s1019_s3 + $0xe8] sm:$0xff]  ;;  %v632_v54 = vpack.c.bf16 %v73_v47, %v72_v46  ;;  %v60_v0 = vld [vmem:[%s1019_s3 + $0xf0] sm:$0xff]  ;;  %v416_v46 = vrot.slane %v760_v8, %v751_v6  ;;  %v701_v47 = vmov 6  }
   0xe   :  { %v90_v51 = vld [vmem:[%s1019_s3 + $0x1e0] sm:$0xff]  ;;  %v91_v52 = vld [vmem:[%s1019_s3 + $0x1e8] sm:$0xff]  ;;  %v602_v56 = vpack.c.bf16 %v59_v50, %v58_v49  ;;  %v61_v1 = vld [vmem:[%s1019_s3 + $0xf8] sm:$0xff]  ;;  %v703_v50 = vmov 7  }
   0xf   :  { %617 = vmatpush3.bf16.msra.mxu1 %v616_v2  ;;  %v29_v55 = vld [vmem:[%s1018_s2] sm:$0xff]  ;;  %v43_v58 = vld [vmem:[%s1019_s3 + $0x68] sm:$0xff]  ;;  %v634_v62 = vpack.c.bf16 %v91_v52, %v90_v51  ;;  %v92_v2 = vld [vmem:[%s1019_s3 + $0x1f0] sm:$0xff]  ;;  %v444_v49 = vcombine.high %v416_v46, %v416_v46  ;;  %v705_v51 = vmov 4   ;;  %v706_v52 = vmov 5  }
  0x10   :  { %v42_v57 = vld [vmem:[%s1019_s3 + $0x60] sm:$0xff]  ;;  %v109_v60 = vrot.slane %v29_v55, %v751_v6  ;;  %v102_v61 = vcombine.high %v29_v55, %v29_v55  ;;  %v75_v63 = vld [vmem:[%s1019_s3 + $0x168] sm:$0xff]  ;;  %v93_v3 = vld [vmem:[%s1019_s3 + $0x1f8] sm:$0xff] }
  0x11   :  { %344 = vrot.lane.b32.xlu0 %v760_v8, %s697_s27  ;;  %v74_v59 = vld [vmem:[%s1019_s3 + $0x160] sm:$0xff] }
  0x15   :  { %352 = vrot.lane.b32.xlu0 %v760_v8, %s698_s28 }
  0x19   :  { %360 = vrot.lane.b32.xlu0 %v760_v8, %s696_s26 }
  0x38   :  { %342 = vadd.xlane.f32.xlu0 %v341_v11  ;;  %v67_v11 = vld [vmem:[%s1019_s3 + $0x128] sm:$0xff] }
  0x7b   :  { %v284_v12 = vpop.permute.xlu0 %283  ;;  %v320_v14 = vpop.permute.xlu1 %319 }
  0x7c   :  { %v286_v13 = vmul.f32 %v284_v12, %v760_v8  ;;  %v322_v18 = vmul.f32 %v320_v14, %v760_v8  ;;  %v52_v14 = vld [vmem:[%s1019_s3 + $0xb0] sm:$0xff] }
  0x7e   :  { %v294_v15 = vrot.slane %v286_v13, %v751_v6  ;;  %v330_v20 = vrot.slane %v322_v18, %v751_v6  ;;  %v618_v13 = vpack.c.bf16 %v83_v9, %v82_v7  ;;  %v604_v7 = vpack.c.bf16 %v43_v58, %v42_v57 }
  0x7f   :  { %v302_v16 = vpop.permute.xlu0 %301  ;;  %v636_v9 = vpack.c.bf16 %v75_v63, %v74_v59 }
  0x80   :  { %v304_v17 = vmul.f32 %v302_v16, %v760_v8  ;;  %295 = vrot.lane.b32.xlu1 %v294_v15, %s697_s27  ;;  %v53_v15 = vld [vmem:[%s1019_s3 + $0xb8] sm:$0xff]  ;;  %v36_v16 = vld [vmem:[%s1019_s3 + $0x30] sm:$0xff]  ;;  %619 = vmatprep.subr.bf16.mxu1 %v618_v13 }
  0x81   :  { %v590_v18 = vpack.c.bf16 %v53_v15, %v52_v14  ;;  %v638_v14 = vpack.c.bf16 %v93_v3, %v92_v2  ;;  %v76_v15 = vld [vmem:[%s1019_s3 + $0x170] sm:$0xff] }
  0x82   :  { %v312_v19 = vrot.slane %v304_v17, %v751_v6  ;;  %v620_v17 = vpack.c.bf16 %v67_v11, %v66_v10  ;;  %v606_v10 = vpack.c.bf16 %v61_v1, %v60_v0  ;;  %v44_v11 = vld [vmem:[%s1019_s3 + $0x70] sm:$0xff] }
  0x83   :  { %v345_v21 = vpop.permute.xlu0 %344 }
  0x84   :  { %313 = vrot.lane.b32.xlu1 %v312_v19, %s698_s28  ;;  %v346_v22 = vrot.slane %v345_v21, 2  ;;  %v37_v19 = vld [vmem:[%s1019_s3 + $0x38] sm:$0xff]  ;;  %621 = vmatpush3.bf16.msra.mxu1 %v620_v17 }
  0x85   :  { %v85_v21 = vld [vmem:[%s1019_s3 + $0x1b8] sm:$0xff] }
  0x86   :  { %v348_v25 = vmul.f32 %v506_v5, %v346_v22 }
  0x87   :  { %v353_v27 = vpop.permute.xlu0 %352 }
  0x88   :  { %331 = vrot.lane.b32.xlu1 %v330_v20, %s696_s26  ;;  %v349_v26 = vsel %vm272_vm0, %v348_v25, 0.0  ;;  %v354_v28 = vrot.slane %v353_v27, 2  ;;  %v84_v20 = vld [vmem:[%s1019_s3 + $0x1b0] sm:$0xff]  ;;  %v54_v25 = vld [vmem:[%s1019_s3 + $0xc0] sm:$0xff]  ;;  %v592_v27 = vpack.c.bf16 %v37_v19, %v36_v16  ;;  %v77_v16 = vld [vmem:[%s1019_s3 + $0x178] sm:$0xff] }
  0x89   :  { %v622_v22 = vpack.c.bf16 %v85_v21, %v84_v20 }
  0x8a   :  { %v356_v33 = vmul.f32 %v506_v5, %v354_v28  ;;  %v86_v28 = vld [vmem:[%s1019_s3 + $0x1c0] sm:$0xff] }
  0x8b   :  { %v361_v30 = vpop.permute.xlu0 %360  ;;  %623 = vmatprep.subr.bf16.mxu1 %v622_v22 }
  0x8c   :  { %v362_v32 = vrot.slane %v361_v30, 2  ;;  %v357_v36 = vsel %vm272_vm0, %v356_v33, 0.0  ;;  %v39_v33 = vld [vmem:[%s1019_s3 + $0x48] sm:$0xff] }
  0x8e   :  { %v364_v37 = vmul.f32 %v506_v5, %v362_v32  ;;  %v35_v5 = vld [vmem:[%s1019_s3 + $0x28] sm:$0xff]  ;;  %v38_v32 = vld [vmem:[%s1019_s3 + $0x40] sm:$0xff] }
  0x8f   :  { %v588_v12 = vpack.c.bf16 %v35_v5, %v34_v4  ;;  %v596_v41 = vpack.c.bf16 %v39_v33, %v38_v32  ;;  %v117_v4 = vcombine.high %v109_v60, %v109_v60  ;;  %v116_v5 = vrot.slane %v102_v61, %v751_v6 }
  0x90   :  { %v365_v40 = vsel %vm272_vm0, %v364_v37, 0.0  ;;  %v56_v37 = vld [vmem:[%s1019_s3 + $0xd0] sm:$0xff]  ;;  %v704_v6 = vmov 3  }
  0x91   :  { %589 = vmatpush3.bf16.msra.mxu0 %v588_v12  ;;  %v45_v12 = vld [vmem:[%s1019_s3 + $0x78] sm:$0xff]  ;;  %v118_v13 = vcombine.high %v116_v5, %v116_v5  ;;  %187 = vmatprep.mubr.f32.mxu0 %v117_v4 }
  0x92   :  { %591 = vmatprep.subr.bf16.mxu0 %v590_v18  ;;  %v608_v17 = vpack.c.bf16 %v45_v12, %v44_v11  ;;  %v640_v18 = vpack.c.bf16 %v77_v16, %v76_v15 }
  0x93   :  { %257 = vmatprep.mubr.f32.mxu1 %v118_v13 }
  0x95   :  { %593 = vmatpush3.bf16.msra.mxu0 %v592_v27 }
  0xac   :  { %274 = vadd.xlane.f32.xlu1 %v273_v24  ;;  %v69_v24 = vld [vmem:[%s1019_s3 + $0x138] sm:$0xff] }
  0xad   :  { %v624_v30 = vpack.c.bf16 %v69_v24, %v68_v23 }
  0xaf   :  { %625 = vmatpush3.bf16.msra.mxu1 %v624_v30 }
  0xb0   :  { %350 = vadd.xlane.f32.xlu1 %v349_v26  ;;  %v55_v26 = vld [vmem:[%s1019_s3 + $0xc8] sm:$0xff] }
  0xc5   :  { %v343_v19 = vpop.xlane.xlu0 %342 }
  0xf2   :  { %v296_v29 = vpop.permute.xlu1 %295 }
  0xf3   :  { %v298_v31 = vsel %vm272_vm0, %v296_v29, 0.0  ;;  %v87_v29 = vld [vmem:[%s1019_s3 + $0x1c8] sm:$0xff] }
  0xf4   :  { %299 = vadd.xlane.f32.xlu0 %v298_v31  ;;  %v594_v31 = vpack.c.bf16 %v55_v26, %v54_v25 }
  0xf6   :  { %v314_v34 = vpop.permute.xlu1 %313  ;;  %595 = vmatprep.subr.bf16.mxu0 %v594_v31  ;;  %v507_v31 = vld [vmem:[%s1022_s6] ss:$0 sm:$0xff] }
  0xf7   :  { %v316_v35 = vsel %vm272_vm0, %v314_v34, 0.0  ;;  %v70_v34 = vld [vmem:[%s1019_s3 + $0x140] sm:$0xff]  ;;  %597 = vmatpush3.bf16.msra.mxu0 %v596_v41  ;;  %v700_v41 = vmov 0  }
  0xf8   :  { %317 = vadd.xlane.f32.xlu0 %v316_v35  ;;  %v626_v35 = vpack.c.bf16 %v87_v29, %v86_v28  ;;  %655 = vset.pattern.permute.xlu1 %v700_v41 }
  0xfa   :  { %v332_v38 = vpop.permute.xlu1 %331  ;;  %627 = vmatprep.subr.bf16.mxu1 %v626_v35 }
  0xfb   :  { %v334_v39 = vsel %vm272_vm0, %v332_v38, 0.0  ;;  %v57_v38 = vld [vmem:[%s1019_s3 + $0xd8] sm:$0xff] }
  0xfc   :  { %358 = vadd.xlane.f32.xlu0 %v357_v36  ;;  %335 = vadd.xlane.f32.xlu1 %v334_v39  ;;  %v71_v36 = vld [vmem:[%s1019_s3 + $0x148] sm:$0xff]  ;;  %v88_v39 = vld [vmem:[%s1019_s3 + $0x1d0] sm:$0xff]  ;;  %v598_v44 = vpack.c.bf16 %v57_v38, %v56_v37 }
  0xfd   :  { %v628_v43 = vpack.c.bf16 %v71_v36, %v70_v34 }
  0xfe   :  { %599 = vmatprep.subr.bf16.mxu0 %v598_v44 }
  0xff   :  { %629 = vmatpush3.bf16.msra.mxu1 %v628_v43  ;;  %601 = vmatpush3.bf16.msra.mxu0 %v600_v53 }
 0x100   :  { %366 = vadd.xlane.f32.xlu1 %v365_v40  ;;  %v89_v40 = vld [vmem:[%s1019_s3 + $0x1d8] sm:$0xff]  ;;  %603 = vmatprep.subr.bf16.mxu0 %v602_v56 }
 0x101   :  { %v630_v48 = vpack.c.bf16 %v89_v40, %v88_v39  ;;  %v699_v40 = vmov 1  }
 0x102   :  { %656 = vset.pattern.permute.xlu0 %v699_v40 }
 0x103   :  { %631 = vmatprep.subr.bf16.mxu1 %v630_v48  ;;  %605 = vmatpush3.bf16.msra.mxu0 %v604_v7  ;;  %v702_v48 = vmov 2  }
 0x104   :  { %633 = vmatpush3.bf16.msra.mxu1 %v632_v54  ;;  %607 = vmatprep.subr.bf16.mxu0 %v606_v10  ;;  %v505_v54 = vld [vmem:[%s1020_s4] ss:$0 sm:$0xff] }
 0x105   :  { %635 = vmatprep.subr.bf16.mxu1 %v634_v62 }
 0x107   :  { %609 = vmatpush3.bf16.msra.mxu0 %v608_v17 }
 0x108   :  { %637 = vmatpush3.bf16.msra.mxu1 %v636_v9 }
 0x109   :  { %639 = vmatprep.subr.bf16.mxu1 %v638_v14 }
 0x10a   :  { %188 = vmatmul.mubr.f32.vlgmr.msra.gmra.mrb[0].mxu0 %v109_v60 }
 0x10c   :  { %641 = vmatpush3.bf16.msra.mxu1 %v640_v18 }
 0x10f   :  { %258 = vmatmul.mubr.f32.vlgmr.msra.gmra.mrb[0].mxu1 %v116_v5 }
 0x139   :  { %v275_v20 = vpop.xlane.xlu1 %274 }
 0x13d   :  { %v351_v22 = vpop.xlane.xlu1 %350 }
 0x181   :  { %v300_v21 = vpop.xlane.xlu0 %299 }
 0x182   :  { %v369_v24 = vsel %vm368_vm1, %v275_v20, %v300_v21 }
 0x185   :  { %v318_v23 = vpop.xlane.xlu0 %317 }
 0x186   :  { %v371_v25 = vsel %vm370_vm2, %v369_v24, %v318_v23 }
 0x189   :  { %v336_v26 = vpop.xlane.xlu1 %335  ;;  %v359_v29 = vpop.xlane.xlu0 %358 }
 0x18a   :  { %v373_v27 = vsel %vm372_vm3, %v371_v25, %v336_v26 }
 0x18b   :  { %v375_v28 = vsel %vm374_vm4, %v373_v27, %v343_v19 }
 0x18c   :  { %v377_v30 = vsel %vm376_vm5, %v375_v28, %v351_v22 }
 0x18d   :  { %v379_v32 = vsel %vm378_vm6, %v377_v30, %v359_v29  ;;  %v367_v33 = vpop.xlane.xlu1 %366 }
 0x18e   :  { %v381_v34 = vsel %vm380_vm7, %v379_v32, %v367_v33 }
 0x18f   :  { %v389_v35 = vadd.f32 %v507_v31, %v381_v34 }
 0x191   :  { %665 = vtanh.f32 %v389_v35 }
 0x19b   :  { %v666_v36 = vpop.eup %665 }
 0x19c   :  { %v391_v37 = vmul.f32 1.442695, %v666_v36 }
 0x19e   :  { %667 = vpow2.f32 %v391_v37 }
 0x1a8   :  { %v668_v38 = vpop.eup %667 }
 0x1a9   :  { %v394_v39 = vsel %vm393_vm8, %v668_v38, 0.0 }
 0x1aa   :  { %395 = vadd.xlane.f32.xlu0 %v394_v39 }
 0x1dd   :  { %v540_v53 = vpop.f32.mrb[0].mxu0 }
 0x1de   :  { %v541_v55 = vpop.f32.mrb[1].mxu0 }
 0x1df   :  { %v542_v57 = vadd.f32 %v541_v55, %v540_v53 }
 0x1e1   :  { %v190_v59 = vadd.f32 %v542_v57, %v505_v54 }
 0x1e2   :  { %v575_v56 = vpop.f32.mrb[0].mxu1 }
 0x1e3   :  { %v576_v58 = vpop.f32.mrb[1].mxu1 }
 0x1e4   :  { %v577_v60 = vadd.f32 %v576_v58, %v575_v56 }
 0x1e6   :  { %v260_v61 = vadd.f32 %v577_v60, %v190_v59 }
 0x1e8   :  { %v263_v27 = vmax.f32 %v260_v61, 0.0 }
 0x237   :  { %v396_v42 = vpop.xlane.xlu0 %395 }
 0x238   :  { %v397_v43 = vadd.f32 1e-10, %v396_v42 }
 0x23a   :  { %669 = vrcp.f32 %v397_v43 }
 0x244   :  { %v670_v44 = vpop.eup %669 }
 0x245   :  { %v399_v45 = vmul.f32 %v670_v44, %v668_v38 }
 0x247   :  { %407 = vperm.xlu0 %656, %v399_v45   ;;  %402 = vperm.xlu1 %655, %v399_v45  }
 0x24b   :  { %661 = vset.pattern.permute.xlu0 %v701_v47  ;;  %417 = vrot.lane.b32.xlu1 %v416_v46, %s697_s27 }
 0x24c   :  { %458 = vperm.xlu0 %661, %v399_v45   ;;  %657 = vset.pattern.permute.xlu1 %v702_v48 }
 0x24f   :  { %426 = vrot.lane.b32.xlu1 %v416_v46, %s698_s28 }
 0x250   :  { %470 = vrot.lane.b32.xlu0 %v444_v49, %s696_s26 }
 0x251   :  { %663 = vset.pattern.permute.xlu0 %v703_v50 }
 0x253   :  { %435 = vrot.lane.b32.xlu1 %v416_v46, %s696_s26 }
 0x257   :  { %452 = vrot.lane.b32.xlu1 %v444_v49, %s697_s27 }
 0x25b   :  { %423 = vperm.xlu1 %657, %v399_v45  }
 0x25f   :  { %658 = vset.pattern.permute.xlu1 %v704_v6 }
 0x260   :  { %432 = vperm.xlu1 %658, %v399_v45  }
 0x264   :  { %659 = vset.pattern.permute.xlu1 %v705_v51 }
 0x265   :  { %441 = vperm.xlu1 %659, %v399_v45  }
 0x269   :  { %660 = vset.pattern.permute.xlu1 %v706_v52 }
 0x26a   :  { %449 = vperm.xlu1 %660, %v399_v45  }
 0x26e   :  { %461 = vrot.lane.b32.xlu1 %v444_v49, %s698_s28 }
 0x26f   :  { %662 = vset.pattern.permute.xlu1 %v703_v50 }
 0x272   :  { %467 = vperm.xlu1 %662, %v399_v45  }
 0x2c6   :  { %v403_v62 = vpop.permute.xlu1 %402  ;;  %v408_v5 = vpop.permute.xlu0 %407 }
 0x2c7   :  { %v405_v10 = vmul.f32 %v403_v62, %v760_v8  ;;  %v27_v8 = vld [vmem:[%s1016_s0] sm:$0x3] }
 0x2ca   :  { %v418_v63 = vpop.permute.xlu1 %417 }
 0x2cb   :  { %v420_v7 = vmul.f32 %v418_v63, %v408_v5  ;;  %v459_v17 = vpop.permute.xlu0 %458 }
 0x2cd   :  { %v421_v12 = vadd.f32 %v420_v7, %v405_v10 }
 0x2ce   :  { %v427_v0 = vpop.permute.xlu1 %426 }
 0x2cf   :  { %v471_v23 = vpop.permute.xlu0 %470 }
 0x2d2   :  { %v436_v1 = vpop.permute.xlu1 %435 }
 0x2d6   :  { %v453_v2 = vpop.permute.xlu1 %452 }
 0x2da   :  { %v424_v3 = vpop.permute.xlu1 %423 }
 0x2db   :  { %v429_v11 = vmul.f32 %v427_v0, %v424_v3 }
 0x2dd   :  { %v430_v15 = vadd.f32 %v429_v11, %v421_v12 }
 0x2df   :  { %v433_v4 = vpop.permute.xlu1 %432 }
 0x2e0   :  { %v438_v13 = vmul.f32 %v436_v1, %v433_v4 }
 0x2e2   :  { %v439_v18 = vadd.f32 %v438_v13, %v430_v15 }
 0x2e4   :  { %v442_v9 = vpop.permute.xlu1 %441 }
 0x2e5   :  { %v446_v16 = vmul.f32 %v444_v49, %v442_v9 }
 0x2e7   :  { %v447_v21 = vadd.f32 %v446_v16, %v439_v18 }
 0x2e9   :  { %v450_v14 = vpop.permute.xlu1 %449 }
 0x2ea   :  { %v455_v19 = vmul.f32 %v453_v2, %v450_v14 }
 0x2ec   :  { %v456_v24 = vadd.f32 %v455_v19, %v447_v21 }
 0x2ed   :  { %v462_v20 = vpop.permute.xlu1 %461 }
 0x2ee   :  { %v464_v22 = vmul.f32 %v462_v20, %v459_v17 }
 0x2f0   :  { %v465_v26 = vadd.f32 %v464_v22, %v456_v24 }
 0x2f1   :  { %v468_v25 = vpop.permute.xlu1 %467 }
 0x2f2   :  { %v473_v28 = vmul.f32 %v471_v23, %v468_v25 }
 0x2f4   :  { %v474_v29 = vadd.f32 %v473_v28, %v465_v26 }
 0x2f6   :  { %v475_v30 = vmul.f32 %v474_v29, %v263_v27 }
 0x2f8   :  { %482 = vrot.lane.b32.xlu0 %v475_v30, %s698_s28  ;;  %v476_v31 = vmul.f32 %v475_v30, %v27_v8 }
 0x2fa   :  { %478 = vrot.lane.b32.xlu1 %v476_v31, %s696_s26 }
 0x36a   :  { %v483_v33 = vpop.permute.xlu0 %482 }
 0x36c   :  { %v479_v32 = vpop.permute.xlu1 %478 }
 0x36d   :  { %v486_v34 = vsel %vm485_vm9, %v27_v8, %v479_v32 }
 0x36e   :  { %v488_v35 = vsel %vm487_vm10, %v486_v34, %v483_v33 }
 0x36f   :  { %490 = vst.msk [vmem:[#allocation2] sm:$0x3] %vm489_vm11, %v488_v35 }
 0x370   :  { %682 = shalt.err (!%p679_p4)
}
 0x371   :  { %s683_s28 = scalar_lea.hbm %s1023_s7, 32 }
 0x372   :  { %p684_p5 = scmp.ne.s32.totalorder %s1023_s7, %s683_s28  ;;  %p687_p6 = scmp.lt.u32.totalorder %s683_s28, %s1023_s7 }
 0x374   :  { %p689_p7 = pnand %p687_p6, %p684_p5 }
 0x376   :  { %692 = shalt.err (!%p689_p7)
}
 0x377   :  { %500 = dma.vmem_to_hbm [thread:$0]  %s498_s1, 32, %s1023_s7, [#allocation3]  }
 0x378   :  { %693 = dma.done.wait [#allocation3], 32  }
 0x379   :  { %694 = vsyncadd [#allocation3], 4294967264 }
 0x37a   :  { %504 = vsyncpa [#allocation3], 1 }

</bundles_post_ra>
